<compile_context>
chip_gen: v6e
topology: v6e:2x2x1
jax: 0.10.0
libtpu: 0.0.40
codegen_flags: <defaults>
</compile_context>

<pallas_src>
import functools

import jax
import jax.numpy as jnp
from jax.experimental import pallas as pl
from jax.experimental.pallas import tpu as pltpu

_LANES = 128
_SUB_ROWS = 256                  # compute sub-chunk: (256,128) f32 = 128 KiB
_BLOCK_BYTES = 4 * 1024 * 1024   # target HBM->VMEM block size per input


def _round_up(x, m):
    return -(-x // m) * m


def _pearson_kernel(x_ref, y_ref, out_ref, acc_ref, *,
                    n, tile_rows, sub_rows, num_tiles, last_valid):
    """Grid axis 0 iterates over row blocks; acc_ref holds 5 running sums."""
    i = pl.program_id(0)

    @pl.when(i == 0)
    def _init():
        acc_ref[...] = jnp.zeros_like(acc_ref)

    num_sub = tile_rows // sub_rows
    groups = sub_rows // 8

    def accumulate(valid_rows):
        """Add this block's five co-moment lane-partials into acc_ref.

        valid_rows: None -> every row of this block is valid (fast path);
                    int  -> only the first `valid_rows` rows are valid, the
                            rest are OOB garbage and must be zeroed.
        """
        def chunk(j, carry):
            sx, sy, sxy, sxx, syy = carry
            r0 = pl.multiple_of(j * sub_rows, sub_rows)
            # x = target, y = pred (matches the PyTorch forward's naming).
            x = x_ref[pl.ds(r0, sub_rows), :].astype(jnp.float32)
            y = y_ref[pl.ds(r0, sub_rows), :].astype(jnp.float32)
            if valid_rows is not None:
                ridx = jax.lax.broadcasted_iota(
                    jnp.int32, (sub_rows, _LANES), 0) + j * sub_rows
                keep = ridx < valid_rows
                # where (not mul) so NaN/Inf garbage is cleanly zeroed.
                x = jnp.where(keep, x, 0.0)
                y = jnp.where(keep, y, 0.0)
            xr = x.reshape(groups, 8, _LANES)   # layout-preserving reshape
            yr = y.reshape(groups, 8, _LANES)
            return (sx + jnp.sum(xr, axis=0),          # Sx
                    sy + jnp.sum(yr, axis=0),          # Sy
                    sxy + jnp.sum(xr * yr, axis=0),    # Sxy
                    sxx + jnp.sum(xr * xr, axis=0),    # Sxx
                    syy + jnp.sum(yr * yr, axis=0))    # Syy

        init = (jnp.zeros((8, _LANES), jnp.float32),) * 5
        if num_sub == 1:
            sums = chunk(0, init)
        else:
            sums = jax.lax.fori_loop(0, num_sub, chunk, init)
        # Single read-modify-write of the resident accumulator per grid step.
        for k in range(5):
            acc_ref[k] += sums[k]

    if last_valid == tile_rows:
        accumulate(None)                  # every block is full: never mask
    elif num_tiles == 1:
        accumulate(last_valid)            # single, partially valid block
    else:
        @pl.when(i < num_tiles - 1)
        def _full_blocks():
            accumulate(None)

        @pl.when(i == num_tiles - 1)
        def _ragged_last_block():
            accumulate(last_valid)

    @pl.when(i == num_tiles - 1)
    def _finalize():
        n_f = float(n)                    # true (unpadded) element count
        sx = jnp.sum(acc_ref[0], keepdims=True)    # (1, 1)
        sy = jnp.sum(acc_ref[1], keepdims=True)
        sxy = jnp.sum(acc_ref[2], keepdims=True)
        sxx = jnp.sum(acc_ref[3], keepdims=True)
        syy = jnp.sum(acc_ref[4], keepdims=True)

        mx = sx / n_f
        my = sy / n_f
        r_num = sxy - n_f * mx * my
        # True values are >= 0; clamp tiny negative rounding error before the
        # sqrt (the PyTorch reference would produce NaN there instead).
        vx = jnp.maximum(sxx - n_f * mx * mx, 0.0)
        vy = jnp.maximum(syy - n_f * my * my, 0.0)
        # NOTE: epsilon is added AFTER the sqrt, matching the PyTorch module.
        r_den = jnp.sqrt(vx * vy) + 1e-05
        r = jnp.clip(r_num / r_den, -1.0, 1.0)
        out_ref[...] = r * r


@jax.jit
def pearson_correlation_loss(pred, target):
    """Pallas implementation of PearsonCorrelationLoss.forward(pred, target)."""
    x = jnp.asarray(target)   # x = target
    y = jnp.asarray(pred)     # y = pred
    if x.dtype != y.dtype:
        common = jnp.result_type(x.dtype, y.dtype)
        x = x.astype(common)
        y = y.astype(common)

    x_flat = x.reshape(-1)
    y_flat = y.reshape(-1)
    n = x_flat.size           # static Python int under jit
    if n == 0:
        return jnp.float32(jnp.nan)

    # Lane alignment: the (rows, 128) reshape is a free bitcast when
    # n % 128 == 0 (the common case); only odd sizes pay a tail-pad copy.
    lane_pad = (-n) % _LANES
    if lane_pad:
        x_flat = jnp.concatenate([x_flat, jnp.zeros((lane_pad,), x_flat.dtype)])
        y_flat = jnp.concatenate([y_flat, jnp.zeros((lane_pad,), y_flat.dtype)])
    rows = (n + lane_pad) // _LANES
    x2d = x_flat.reshape(rows, _LANES)
    y2d = y_flat.reshape(rows, _LANES)

    itemsize = x2d.dtype.itemsize
    max_tile_rows = max(_SUB_ROWS, _BLOCK_BYTES // (_LANES * itemsize))
    if rows >= max_tile_rows:
        tile_rows = max_tile_rows                 # multiple of _SUB_ROWS
    elif rows > _SUB_ROWS:
        tile_rows = _round_up(rows, _SUB_ROWS)    # single block
    else:
        tile_rows = _round_up(rows, 16)           # single small block
    sub_rows = min(_SUB_ROWS, tile_rows)
    num_tiles = pl.cdiv(rows, tile_rows)
    last_valid = rows - (num_tiles - 1) * tile_rows  # valid rows in last block

    kernel = functools.partial(
        _pearson_kernel, n=n, tile_rows=tile_rows, sub_rows=sub_rows,
        num_tiles=num_tiles, last_valid=last_valid)

    grid_spec = pltpu.PrefetchScalarGridSpec(
        num_scalar_prefetch=0,
        grid=(num_tiles,),
        in_specs=[
            pl.BlockSpec((tile_rows, _LANES), lambda i: (i, 0)),
            pl.BlockSpec((tile_rows, _LANES), lambda i: (i, 0)),
        ],
        out_specs=pl.BlockSpec((1, 1), lambda i: (0, 0)),
        scratch_shapes=[pltpu.VMEM((5, 8, _LANES), jnp.float32)],
    )

    out = pl.pallas_call(
        kernel,
        out_shape=jax.ShapeDtypeStruct((1, 1), jnp.float32),
        grid_spec=grid_spec,
        compiler_params=pltpu.CompilerParams(
            dimension_semantics=("arbitrary",),   # reduction with resident acc
            vmem_limit_bytes=32 * 1024 * 1024,
        ),
        cost_estimate=pl.CostEstimate(
            flops=8 * n, transcendentals=1,
            bytes_accessed=2 * n * itemsize + 4),
    )(x2d, y2d)
    return out[0, 0]


def _reference(pred, target):
    x = jnp.asarray(target, jnp.float32)
    y = jnp.asarray(pred, jnp.float32)
    mx = jnp.mean(x)
    my = jnp.mean(y)
    xm = x - mx
    ym = y - my
    r_num = jnp.sum(xm * ym)
    r_den = jnp.sqrt(jnp.sum(xm ** 2) * jnp.sum(ym ** 2)) + 1e-05
    r = jnp.clip(r_num / r_den, -1.0, 1.0)
    return r ** 2


if __name__ == "__main__":
    key = jax.random.PRNGKey(0)
    k1, k2, k3, k4, k5, k6, k7, k8 = jax.random.split(key, 8)

    # 1) Small loss-style input (n % 128 != 0 -> tiny pad + masked single tile).
    pred = jax.random.normal(k1, (2, 16), dtype=jnp.float32)
    target = 0.5 * pred + 0.5 * jax.random.normal(k2, (2, 16), dtype=jnp.float32)
    out = jax.block_until_ready(pearson_correlation_loss(pred, target))
    ref = jax.block_until_ready(_reference(pred, target))
    assert jnp.allclose(out, ref, atol=1e-5, rtol=1e-4), (out, ref)

    # 2) Lane-aligned input: zero-copy path, single block, fori_loop sub-chunks.
    pred2 = jax.random.normal(k3, (16, 8192), dtype=jnp.float32)
    target2 = 0.3 * pred2 + jax.random.normal(k4, (16, 8192), dtype=jnp.float32)
    out2 = jax.block_until_ready(pearson_correlation_loss(pred2, target2))
    ref2 = jax.block_until_ready(_reference(pred2, target2))
    assert jnp.allclose(out2, ref2, atol=1e-4, rtol=1e-3), (out2, ref2)

    # 3) Multi-block grid with a ragged, masked last block (zero-copy path).
    pred3 = jax.random.normal(k5, (150, 8192), dtype=jnp.float32)
    target3 = 0.4 * pred3 + jax.random.normal(k6, (150, 8192), dtype=jnp.float32)
    out3 = jax.block_until_ready(pearson_correlation_loss(pred3, target3))
    ref3 = jax.block_until_ready(_reference(pred3, target3))
    assert jnp.allclose(out3, ref3, atol=1e-3, rtol=1e-2), (out3, ref3)

    # 4) bf16 inputs (in-kernel cast path), small and lane-aligned.
    pred4 = jax.random.normal(k7, (4, 256), dtype=jnp.bfloat16)
    target4 = (0.5 * pred4
               + 0.5 * jax.random.normal(k8, (4, 256), dtype=jnp.bfloat16))
    out4 = jax.block_until_ready(pearson_correlation_loss(pred4, target4))
    ref4 = jax.block_until_ready(_reference(pred4, target4))
    assert jnp.allclose(out4, ref4, atol=1e-3, rtol=1e-2), (out4, ref4)

    print("KERNEL_OK")
</pallas_src>

<mosaic_0001>
module attributes {stable_mosaic.version = 11 : i64} {
  func.func @_pearson_kernel(%arg0: i32, %arg1: memref<16x128xf32, #tpu.memory_space<vmem>>, %arg2: memref<16x128xf32, #tpu.memory_space<vmem>>, %arg3: memref<1x1xf32, #tpu.memory_space<vmem>>, %arg4: memref<5x8x128xf32, #tpu.memory_space<vmem>>) attributes {dimension_semantics = [#tpu.dimension_semantics<arbitrary>], iteration_bounds = array<i64: 1>, scalar_prefetch = 0 : i64, scratch_operands = 1 : i64, tpu.core_type = #tpu.core_type<tc>, window_params = [{transform_indices = @transform_0, window_bounds = array<i64: 16, 128>}, {transform_indices = @transform_1, window_bounds = array<i64: 16, 128>}, {pipeline_mode = #tpu.pipeline_mode<synchronous>, transform_indices = @transform_2, window_bounds = array<i64: 1, 1>}]} {
    %c0_i32 = arith.constant 0 : i32
    %0 = arith.cmpi eq, %arg0, %c0_i32 : i32
    %1 = arith.extui %0 : i1 to i32
    %c0_i32_0 = arith.constant 0 : i32
    %2 = arith.cmpi ne, %1, %c0_i32_0 : i32
    scf.if %2 {
      %cst_39 = arith.constant 0.000000e+00 : f32
      %66 = vector.broadcast %cst_39 : f32 to vector<5x8x128xf32>
      %c0_40 = arith.constant 0 : index
      %c0_41 = arith.constant 0 : index
      %c0_42 = arith.constant 0 : index
      %67 = vector.load %arg4[%c0_40, %c0_41, %c0_42] : memref<5x8x128xf32, #tpu.memory_space<vmem>>, vector<5x8x128xf32>
      tpu.vector_store %arg4[%c0_40, %c0_41, %c0_42], %66 {strides = array<i32>} : memref<5x8x128xf32, #tpu.memory_space<vmem>>, vector<5x8x128xf32>,
    } else {
    }
    %cst = arith.constant 0.000000e+00 : f32
    %3 = vector.broadcast %cst : f32 to vector<8x128xf32>
    %c0_i32_1 = arith.constant 0 : i32
    %4 = tpu.assume_multiple %c0_i32_1, 16 : i32
    %5 = arith.index_cast %4 : i32 to index
    %c0 = arith.constant 0 : index
    %6 = vector.load %arg1[%5, %c0] : memref<16x128xf32, #tpu.memory_space<vmem>>, vector<16x128xf32>
    %7 = arith.index_cast %4 : i32 to index
    %c0_2 = arith.constant 0 : index
    %8 = vector.load %arg2[%7, %c0_2] : memref<16x128xf32, #tpu.memory_space<vmem>>, vector<16x128xf32>
    %9 = tpu.iota {dimensions = array<i32: 0>} : vector<16x128xi32>
    %c0_i32_3 = arith.constant 0 : i32
    %10 = vector.broadcast %c0_i32_3 : i32 to vector<16x128xi32>
    %11 = arith.addi %9, %10 : vector<16x128xi32>
    %c1_i32 = arith.constant 1 : i32
    %12 = vector.broadcast %c1_i32 : i32 to vector<16x128xi32>
    %13 = arith.cmpi slt, %11, %12 : vector<16x128xi32>
    %cst_4 = arith.constant 0.000000e+00 : f32
    %14 = vector.broadcast %cst_4 : f32 to vector<16x128xf32>
    %15 = arith.select %13, %6, %14 : vector<16x128xi1>, vector<16x128xf32>
    %cst_5 = arith.constant 0.000000e+00 : f32
    %16 = vector.broadcast %cst_5 : f32 to vector<16x128xf32>
    %17 = arith.select %13, %8, %16 : vector<16x128xi1>, vector<16x128xf32>
    %18 = vector.shape_cast %15 : vector<16x128xf32> to vector<2x8x128xf32>
    %19 = vector.shape_cast %17 : vector<16x128xf32> to vector<2x8x128xf32>
    %cst_6 = arith.constant dense<0.000000e+00> : vector<8x128xf32>
    %20 = vector.multi_reduction <add>, %18, %cst_6 [0] : vector<2x8x128xf32> to vector<8x128xf32>
    %21 = arith.addf %3, %20 : vector<8x128xf32>
    %cst_7 = arith.constant dense<0.000000e+00> : vector<8x128xf32>
    %22 = vector.multi_reduction <add>, %19, %cst_7 [0] : vector<2x8x128xf32> to vector<8x128xf32>
    %23 = arith.addf %3, %22 : vector<8x128xf32>
    %24 = arith.mulf %18, %19 : vector<2x8x128xf32>
    %cst_8 = arith.constant dense<0.000000e+00> : vector<8x128xf32>
    %25 = vector.multi_reduction <add>, %24, %cst_8 [0] : vector<2x8x128xf32> to vector<8x128xf32>
    %26 = arith.addf %3, %25 : vector<8x128xf32>
    %27 = arith.mulf %18, %18 : vector<2x8x128xf32>
    %cst_9 = arith.constant dense<0.000000e+00> : vector<8x128xf32>
    %28 = vector.multi_reduction <add>, %27, %cst_9 [0] : vector<2x8x128xf32> to vector<8x128xf32>
    %29 = arith.addf %3, %28 : vector<8x128xf32>
    %30 = arith.mulf %19, %19 : vector<2x8x128xf32>
    %cst_10 = arith.constant dense<0.000000e+00> : vector<8x128xf32>
    %31 = vector.multi_reduction <add>, %30, %cst_10 [0] : vector<2x8x128xf32> to vector<8x128xf32>
    %32 = arith.addf %3, %31 : vector<8x128xf32>
    %c0_11 = arith.constant 0 : index
    %c0_12 = arith.constant 0 : index
    %c0_13 = arith.constant 0 : index
    %33 = vector.load %arg4[%c0_11, %c0_12, %c0_13] : memref<5x8x128xf32, #tpu.memory_space<vmem>>, vector<1x8x128xf32>
    %34 = vector.shape_cast %33 : vector<1x8x128xf32> to vector<8x128xf32>
    %35 = arith.addf %34, %21 : vector<8x128xf32>
    %c0_14 = arith.constant 0 : index
    %c0_15 = arith.constant 0 : index
    %c0_16 = arith.constant 0 : index
    %36 = vector.load %arg4[%c0_14, %c0_15, %c0_16] : memref<5x8x128xf32, #tpu.memory_space<vmem>>, vector<1x8x128xf32>
    %37 = vector.shape_cast %36 : vector<1x8x128xf32> to vector<8x128xf32>
    %38 = vector.shape_cast %35 : vector<8x128xf32> to vector<1x8x128xf32>
    tpu.vector_store %arg4[%c0_14, %c0_15, %c0_16], %38 {strides = array<i32>} : memref<5x8x128xf32, #tpu.memory_space<vmem>>, vector<1x8x128xf32>,
    %c1 = arith.constant 1 : index
    %c0_17 = arith.constant 0 : index
    %c0_18 = arith.constant 0 : index
    %39 = vector.load %arg4[%c1, %c0_17, %c0_18] : memref<5x8x128xf32, #tpu.memory_space<vmem>>, vector<1x8x128xf32>
    %40 = vector.shape_cast %39 : vector<1x8x128xf32> to vector<8x128xf32>
    %41 = arith.addf %40, %23 : vector<8x128xf32>
    %c1_19 = arith.constant 1 : index
    %c0_20 = arith.constant 0 : index
    %c0_21 = arith.constant 0 : index
    %42 = vector.load %arg4[%c1_19, %c0_20, %c0_21] : memref<5x8x128xf32, #tpu.memory_space<vmem>>, vector<1x8x128xf32>
    %43 = vector.shape_cast %42 : vector<1x8x128xf32> to vector<8x128xf32>
    %44 = vector.shape_cast %41 : vector<8x128xf32> to vector<1x8x128xf32>
    tpu.vector_store %arg4[%c1_19, %c0_20, %c0_21], %44 {strides = array<i32>} : memref<5x8x128xf32, #tpu.memory_space<vmem>>, vector<1x8x128xf32>,
    %c2 = arith.constant 2 : index
    %c0_22 = arith.constant 0 : index
    %c0_23 = arith.constant 0 : index
    %45 = vector.load %arg4[%c2, %c0_22, %c0_23] : memref<5x8x128xf32, #tpu.memory_space<vmem>>, vector<1x8x128xf32>
    %46 = vector.shape_cast %45 : vector<1x8x128xf32> to vector<8x128xf32>
    %47 = arith.addf %46, %26 : vector<8x128xf32>
    %c2_24 = arith.constant 2 : index
    %c0_25 = arith.constant 0 : index
    %c0_26 = arith.constant 0 : index
    %48 = vector.load %arg4[%c2_24, %c0_25, %c0_26] : memref<5x8x128xf32, #tpu.memory_space<vmem>>, vector<1x8x128xf32>
    %49 = vector.shape_cast %48 : vector<1x8x128xf32> to vector<8x128xf32>
    %50 = vector.shape_cast %47 : vector<8x128xf32> to vector<1x8x128xf32>
    tpu.vector_store %arg4[%c2_24, %c0_25, %c0_26], %50 {strides = array<i32>} : memref<5x8x128xf32, #tpu.memory_space<vmem>>, vector<1x8x128xf32>,
    %c3 = arith.constant 3 : index
    %c0_27 = arith.constant 0 : index
    %c0_28 = arith.constant 0 : index
    %51 = vector.load %arg4[%c3, %c0_27, %c0_28] : memref<5x8x128xf32, #tpu.memory_space<vmem>>, vector<1x8x128xf32>
    %52 = vector.shape_cast %51 : vector<1x8x128xf32> to vector<8x128xf32>
    %53 = arith.addf %52, %29 : vector<8x128xf32>
    %c3_29 = arith.constant 3 : index
    %c0_30 = arith.constant 0 : index
    %c0_31 = arith.constant 0 : index
    %54 = vector.load %arg4[%c3_29, %c0_30, %c0_31] : memref<5x8x128xf32, #tpu.memory_space<vmem>>, vector<1x8x128xf32>
    %55 = vector.shape_cast %54 : vector<1x8x128xf32> to vector<8x128xf32>
    %56 = vector.shape_cast %53 : vector<8x128xf32> to vector<1x8x128xf32>
    tpu.vector_store %arg4[%c3_29, %c0_30, %c0_31], %56 {strides = array<i32>} : memref<5x8x128xf32, #tpu.memory_space<vmem>>, vector<1x8x128xf32>,
    %c4 = arith.constant 4 : index
    %c0_32 = arith.constant 0 : index
    %c0_33 = arith.constant 0 : index
    %57 = vector.load %arg4[%c4, %c0_32, %c0_33] : memref<5x8x128xf32, #tpu.memory_space<vmem>>, vector<1x8x128xf32>
    %58 = vector.shape_cast %57 : vector<1x8x128xf32> to vector<8x128xf32>
    %59 = arith.addf %58, %32 : vector<8x128xf32>
    %c4_34 = arith.constant 4 : index
    %c0_35 = arith.constant 0 : index
    %c0_36 = arith.constant 0 : index
    %60 = vector.load %arg4[%c4_34, %c0_35, %c0_36] : memref<5x8x128xf32, #tpu.memory_space<vmem>>, vector<1x8x128xf32>
    %61 = vector.shape_cast %60 : vector<1x8x128xf32> to vector<8x128xf32>
    %62 = vector.shape_cast %59 : vector<8x128xf32> to vector<1x8x128xf32>
    tpu.vector_store %arg4[%c4_34, %c0_35, %c0_36], %62 {strides = array<i32>} : memref<5x8x128xf32, #tpu.memory_space<vmem>>, vector<1x8x128xf32>,
    %c0_i32_37 = arith.constant 0 : i32
    %63 = arith.cmpi eq, %arg0, %c0_i32_37 : i32
    %64 = arith.extui %63 : i1 to i32
    %c0_i32_38 = arith.constant 0 : i32
    %65 = arith.cmpi ne, %64, %c0_i32_38 : i32
    scf.if %65 {
      %c0_39 = arith.constant 0 : index
      %c0_40 = arith.constant 0 : index
      %c0_41 = arith.constant 0 : index
      %66 = vector.load %arg4[%c0_39, %c0_40, %c0_41] : memref<5x8x128xf32, #tpu.memory_space<vmem>>, vector<1x8x128xf32>
      %67 = vector.shape_cast %66 : vector<1x8x128xf32> to vector<8x128xf32>
      %68 = vector.shape_cast %67 : vector<8x128xf32> to vector<1x8x128xf32>
      %cst_42 = arith.constant dense<0.000000e+00> : vector<1xf32>
      %69 = vector.multi_reduction <add>, %68, %cst_42 [1, 2] : vector<1x8x128xf32> to vector<1xf32>
      %70 = vector.shape_cast %69 : vector<1xf32> to vector<1x1x1xf32>
      %71 = vector.extract %70[0, 0, 0] : f32 from vector<1x1x1xf32>
      %72 = vector.broadcast %71 : f32 to vector<1x1xf32>
      %c1_43 = arith.constant 1 : index
      %c0_44 = arith.constant 0 : index
      %c0_45 = arith.constant 0 : index
      %73 = vector.load %arg4[%c1_43, %c0_44, %c0_45] : memref<5x8x128xf32, #tpu.memory_space<vmem>>, vector<1x8x128xf32>
      %74 = vector.shape_cast %73 : vector<1x8x128xf32> to vector<8x128xf32>
      %75 = vector.shape_cast %74 : vector<8x128xf32> to vector<1x8x128xf32>
      %cst_46 = arith.constant dense<0.000000e+00> : vector<1xf32>
      %76 = vector.multi_reduction <add>, %75, %cst_46 [1, 2] : vector<1x8x128xf32> to vector<1xf32>
      %77 = vector.shape_cast %76 : vector<1xf32> to vector<1x1x1xf32>
      %78 = vector.extract %77[0, 0, 0] : f32 from vector<1x1x1xf32>
      %79 = vector.broadcast %78 : f32 to vector<1x1xf32>
      %c2_47 = arith.constant 2 : index
      %c0_48 = arith.constant 0 : index
      %c0_49 = arith.constant 0 : index
      %80 = vector.load %arg4[%c2_47, %c0_48, %c0_49] : memref<5x8x128xf32, #tpu.memory_space<vmem>>, vector<1x8x128xf32>
      %81 = vector.shape_cast %80 : vector<1x8x128xf32> to vector<8x128xf32>
      %82 = vector.shape_cast %81 : vector<8x128xf32> to vector<1x8x128xf32>
      %cst_50 = arith.constant dense<0.000000e+00> : vector<1xf32>
      %83 = vector.multi_reduction <add>, %82, %cst_50 [1, 2] : vector<1x8x128xf32> to vector<1xf32>
      %84 = vector.shape_cast %83 : vector<1xf32> to vector<1x1x1xf32>
      %85 = vector.extract %84[0, 0, 0] : f32 from vector<1x1x1xf32>
      %86 = vector.broadcast %85 : f32 to vector<1x1xf32>
      %c3_51 = arith.constant 3 : index
      %c0_52 = arith.constant 0 : index
      %c0_53 = arith.constant 0 : index
      %87 = vector.load %arg4[%c3_51, %c0_52, %c0_53] : memref<5x8x128xf32, #tpu.memory_space<vmem>>, vector<1x8x128xf32>
      %88 = vector.shape_cast %87 : vector<1x8x128xf32> to vector<8x128xf32>
      %89 = vector.shape_cast %88 : vector<8x128xf32> to vector<1x8x128xf32>
      %cst_54 = arith.constant dense<0.000000e+00> : vector<1xf32>
      %90 = vector.multi_reduction <add>, %89, %cst_54 [1, 2] : vector<1x8x128xf32> to vector<1xf32>
      %91 = vector.shape_cast %90 : vector<1xf32> to vector<1x1x1xf32>
      %92 = vector.extract %91[0, 0, 0] : f32 from vector<1x1x1xf32>
      %93 = vector.broadcast %92 : f32 to vector<1x1xf32>
      %c4_55 = arith.constant 4 : index
      %c0_56 = arith.constant 0 : index
      %c0_57 = arith.constant 0 : index
      %94 = vector.load %arg4[%c4_55, %c0_56, %c0_57] : memref<5x8x128xf32, #tpu.memory_space<vmem>>, vector<1x8x128xf32>
      %95 = vector.shape_cast %94 : vector<1x8x128xf32> to vector<8x128xf32>
      %96 = vector.shape_cast %95 : vector<8x128xf32> to vector<1x8x128xf32>
      %cst_58 = arith.constant dense<0.000000e+00> : vector<1xf32>
      %97 = vector.multi_reduction <add>, %96, %cst_58 [1, 2] : vector<1x8x128xf32> to vector<1xf32>
      %98 = vector.shape_cast %97 : vector<1xf32> to vector<1x1x1xf32>
      %99 = vector.extract %98[0, 0, 0] : f32 from vector<1x1x1xf32>
      %100 = vector.broadcast %99 : f32 to vector<1x1xf32>
      %cst_59 = arith.constant 3.200000e+01 : f32
      %101 = vector.broadcast %cst_59 : f32 to vector<1x1xf32>
      %102 = arith.divf %72, %101 : vector<1x1xf32>
      %cst_60 = arith.constant 3.200000e+01 : f32
      %103 = vector.broadcast %cst_60 : f32 to vector<1x1xf32>
      %104 = arith.divf %79, %103 : vector<1x1xf32>
      %cst_61 = arith.constant 3.200000e+01 : f32
      %105 = vector.broadcast %cst_61 : f32 to vector<1x1xf32>
      %106 = arith.mulf %105, %102 : vector<1x1xf32>
      %107 = arith.mulf %106, %104 : vector<1x1xf32>
      %108 = arith.subf %86, %107 : vector<1x1xf32>
      %cst_62 = arith.constant 3.200000e+01 : f32
      %109 = vector.broadcast %cst_62 : f32 to vector<1x1xf32>
      %110 = arith.mulf %109, %102 : vector<1x1xf32>
      %111 = arith.mulf %110, %102 : vector<1x1xf32>
      %112 = arith.subf %93, %111 : vector<1x1xf32>
      %cst_63 = arith.constant 0.000000e+00 : f32
      %113 = vector.broadcast %cst_63 : f32 to vector<1x1xf32>
      %114 = arith.maximumf %112, %113 : vector<1x1xf32>
      %cst_64 = arith.constant 3.200000e+01 : f32
      %115 = vector.broadcast %cst_64 : f32 to vector<1x1xf32>
      %116 = arith.mulf %115, %104 : vector<1x1xf32>
      %117 = arith.mulf %116, %104 : vector<1x1xf32>
      %118 = arith.subf %100, %117 : vector<1x1xf32>
      %cst_65 = arith.constant 0.000000e+00 : f32
      %119 = vector.broadcast %cst_65 : f32 to vector<1x1xf32>
      %120 = arith.maximumf %118, %119 : vector<1x1xf32>
      %121 = arith.mulf %114, %120 : vector<1x1xf32>
      %122 = math.sqrt %121 : vector<1x1xf32>
      %cst_66 = arith.constant 9.99999974E-6 : f32
      %123 = vector.broadcast %cst_66 : f32 to vector<1x1xf32>
      %124 = arith.addf %122, %123 : vector<1x1xf32>
      %125 = arith.divf %108, %124 : vector<1x1xf32>
      %cst_67 = arith.constant -1.000000e+00 : f32
      %cst_68 = arith.constant 1.000000e+00 : f32
      %126 = vector.broadcast %cst_67 : f32 to vector<1x1xf32>
      %127 = arith.maximumf %126, %125 : vector<1x1xf32>
      %128 = vector.broadcast %cst_68 : f32 to vector<1x1xf32>
      %129 = arith.minimumf %128, %127 : vector<1x1xf32>
      %130 = arith.mulf %129, %129 : vector<1x1xf32>
      %c0_69 = arith.constant 0 : index
      %c0_70 = arith.constant 0 : index
      %131 = vector.load %arg3[%c0_69, %c0_70] : memref<1x1xf32, #tpu.memory_space<vmem>>, vector<1x1xf32>
      tpu.vector_store %arg3[%c0_69, %c0_70], %130 {strides = array<i32>} : memref<1x1xf32, #tpu.memory_space<vmem>>, vector<1x1xf32>,
    } else {
    }
    return
  }
  func.func @transform_0(%arg0: i32) -> (i32, i32) {
    %c0_i32 = arith.constant 0 : i32
    %c0_i32_0 = arith.constant 0 : i32
    return %arg0, %c0_i32 : i32, i32
  }
  func.func @transform_1(%arg0: i32) -> (i32, i32) {
    %c0_i32 = arith.constant 0 : i32
    %c0_i32_0 = arith.constant 0 : i32
    return %arg0, %c0_i32 : i32, i32
  }
  func.func @transform_2(%arg0: i32) -> (i32, i32) {
    %c0_i32 = arith.constant 0 : i32
    %c0_i32_0 = arith.constant 0 : i32
    %c0_i32_1 = arith.constant 0 : i32
    return %c0_i32, %c0_i32_0 : i32, i32
  }
}

</mosaic_0001>

<bundles_post_ra>
// kernel: pearson_correlation_loss.1
= control target key start
LH: loop header
LB: loop body
LE: loop exit
PB: predicated region body
PF: predicated region fallthrough
CT: control target
= control target key end

     0   :  { %v25_v0 = vlaneseq  ;;  %s233_s0 = inlined_call_operand.vmem [shape: f32[1,128], index: 0, kind: input, shape index: {}]   ;;  %s234_s1 = inlined_call_operand.vmem [shape: f32[1,128], index: 1, kind: input, shape index: {}]   ;;  %s235_s2 = inlined_call_operand.hbm [shape: f32[1,1], index: 2, kind: output, shape index: {}]  }
   0x1   :  { %7 = vsyncpa [#allocation4], 0  ;;  %v21_v1 = vld [vmem:[%s233_s0] sm:$0xff]  ;;  %s208_s16 = smov [#allocation3]   ;;  %vm154_vm3 = vcmask 0  }
   0x2   :  { %v26_v2 = vshrl.u32 %v25_v0, 7  ;;  %v23_v3 = vld [vmem:[%s234_s1] sm:$0xff]  ;;  %s162_s17 = sshll.u32 %s208_s16, 4  ;;  %s163_s17 = int_to_ptr.vmem [resolvable:$true] %s162_s17 }
   0x3   :  { %s186_s18 = scalar_lea.vmem %s163_s17, 16  ;;  %s190_s19 = scalar_lea.vmem %s163_s17, 32 }
   0x4   :  { %vm28_vm0 = vcmp.lt.s32.totalorder %v26_v2, 1  ;;  %p187_p0 = scmp.ne.s32.totalorder %s163_s17, %s186_s18  ;;  %p191_p1 = scmp.lt.s32.totalorder %s163_s17, %s163_s17 }
   0x5   :  { %v30_v4 = vsel %vm28_vm0, %v21_v1, 0.0  ;;  %v32_v5 = vsel %vm28_vm0, %v23_v3, 0.0  ;;  %p192_p2 = scmp.lt.s32.totalorder %s190_s19, %s186_s18 }
   0x6   :  { %73 = vadd.xlane.f32.xlu0 %v30_v4  ;;  %v38_v6 = vmul.f32 %v32_v5, %v30_v4  ;;  %v42_v7 = vmul.f32 %v30_v4, %v30_v4  ;;  %v46_v8 = vmul.f32 %v32_v5, %v32_v5 }
   0x7   :  { %p193_p3 = por %p192_p2, %p191_p1 }
   0x8   :  { %95 = vadd.xlane.f32.xlu1 %v38_v6 }
   0x9   :  { %p194_p4 = pnand %p193_p3, %p187_p0 }
   0xa   :  { %84 = vadd.xlane.f32.xlu0 %v32_v5 }
   0xc   :  { %106 = vadd.xlane.f32.xlu1 %v42_v7 }
   0xe   :  { %117 = vadd.xlane.f32.xlu0 %v46_v8 }
  0x8f   :  { %v74_v9 = vpop.xlane.xlu0 %73 }
  0x90   :  { %v75_v10 = vrot.slane %v74_v9, 4 }
  0x91   :  { %v96_v11 = vpop.xlane.xlu1 %95 }
  0x92   :  { %v76_v12 = vadd.f32 %v75_v10, %v74_v9  ;;  %v97_v13 = vrot.slane %v96_v11, 4 }
  0x93   :  { %v85_v14 = vpop.xlane.xlu0 %84 }
  0x94   :  { %v77_v15 = vrot.slane %v76_v12, 2  ;;  %v98_v16 = vadd.f32 %v97_v13, %v96_v11  ;;  %v86_v17 = vrot.slane %v85_v14, 4 }
  0x95   :  { %v107_v18 = vpop.xlane.xlu1 %106 }
  0x96   :  { %v99_v19 = vrot.slane %v98_v16, 2  ;;  %v87_v20 = vadd.f32 %v86_v17, %v85_v14  ;;  %v108_v21 = vrot.slane %v107_v18, 4  ;;  %v78_v22 = vadd.f32 %v77_v15, %v76_v12 }
  0x97   :  { %v118_v23 = vpop.xlane.xlu0 %117 }
  0x98   :  { %v88_v24 = vrot.slane %v87_v20, 2  ;;  %v109_v25 = vadd.f32 %v108_v21, %v107_v18  ;;  %v119_v26 = vrot.slane %v118_v23, 4  ;;  %v79_v27 = vrot.slane %v78_v22, 1 }
  0x99   :  { %v100_v28 = vadd.f32 %v99_v19, %v98_v16 }
  0x9a   :  { %v110_v29 = vrot.slane %v109_v25, 2  ;;  %v120_v30 = vadd.f32 %v119_v26, %v118_v23  ;;  %v80_v31 = vadd.f32 %v79_v27, %v78_v22  ;;  %v89_v32 = vadd.f32 %v88_v24, %v87_v20 }
  0x9b   :  { %v101_v33 = vrot.slane %v100_v28, 1 }
  0x9c   :  { %v111_v34 = vadd.f32 %v110_v29, %v109_v25  ;;  %v121_v35 = vrot.slane %v120_v30, 2  ;;  %171 = vpush %v80_v31  ;;  %v90_v36 = vrot.slane %v89_v32, 1 }
  0x9d   :  { %v102_v40 = vadd.f32 %v101_v33, %v100_v28 }
  0x9e   :  { %v122_v37 = vadd.f32 %v121_v35, %v120_v30  ;;  %v91_v38 = vadd.f32 %v90_v36, %v89_v32  ;;  %v112_v39 = vrot.slane %v111_v34, 1 }
  0xa0   :  { %173 = vpush %v91_v38  ;;  %v113_v41 = vadd.f32 %v112_v39, %v111_v34  ;;  %v123_v42 = vrot.slane %v122_v37, 1 }
  0xa1   :  { %175 = vpush %v102_v40 }
  0xa2   :  { %177 = vpush %v113_v41  ;;  %v124_v43 = vadd.f32 %v123_v42, %v122_v37 }
  0xa4   :  { %179 = vpush %v124_v43 }
  0xcd   :  { %s172_s0 = spop %171 }
  0xce   :  { %v82_v44 = vstv %s172_s0 }
  0xcf   :  { %v128_v45 = vmul.f32 0.03125, %v82_v44 }
  0xd1   :  { %v130_v46 = vmul.f32 32.0, %v128_v45  ;;  %s174_s1 = spop %173 }
  0xd2   :  { %v93_v47 = vstv %s174_s1  ;;  %s176_s13 = spop %175 }
  0xd3   :  { %v133_v48 = vmul.f32 %v130_v46, %v128_v45  ;;  %v129_v49 = vmul.f32 0.03125, %v93_v47  ;;  %s178_s14 = spop %177  ;;  %v104_v2 = vstv %s176_s13 }
  0xd4   :  { %v115_v50 = vstv %s178_s14 }
  0xd5   :  { %s180_s15 = spop %179  ;;  %v136_v51 = vmul.f32 32.0, %v129_v49  ;;  %v134_v52 = vsub.f32 %v115_v50, %v133_v48  ;;  %v131_v1 = vmul.f32 %v130_v46, %v129_v49 }
  0xd6   :  { %v126_v54 = vstv %s180_s15 }
  0xd7   :  { %v137_v53 = vmul.f32 %v136_v51, %v129_v49  ;;  %v135_v56 = vmax.f32 %v134_v52, 0.0  ;;  %v132_v3 = vsub.f32 %v104_v2, %v131_v1 }
  0xd9   :  { %v138_v55 = vsub.f32 %v126_v54, %v137_v53 }
  0xdb   :  { %v139_v57 = vmax.f32 %v138_v55, 0.0 }
  0xdd   :  { %v140_v58 = vmul.f32 %v139_v57, %v135_v56 }
  0xdf   :  { %182 = vrsqrt.f32 %v140_v58  ;;  %vm143_vm1 = vcmp.eq.f32.partialorder %v140_v58, inf  ;;  %v146_v61 = vand.u32 2147483648, %v140_v58  ;;  %vm145_vm2 = vcmp.eq.f32.partialorder %v140_v58, 0.0 }
  0xec   :  { %v183_v59 = vpop.eup %182 }
  0xed   :  { %v142_v60 = vmul.f32 %v183_v59, %v140_v58 }
  0xef   :  { %v144_v62 = vsel %vm143_vm1, %v140_v58, %v142_v60 }
  0xf0   :  { %v147_v63 = vsel %vm145_vm2, %v146_v61, %v144_v62 }
  0xf1   :  { %v148_v0 = vadd.f32 1e-05, %v147_v63 }
  0xf3   :  { %184 = vrcp.f32 %v148_v0 }
 0x100   :  { %v185_v4 = vpop.eup %184 }
 0x101   :  { %v150_v5 = vmul.f32 %v185_v4, %v132_v3 }
 0x103   :  { %v170_v6 = vclamps-f32 %v150_v5, 1.0 }
 0x105   :  { %v153_v7 = vmul.f32 %v170_v6, %v170_v6 }
 0x107   :  { %155 = vst.msk [vmem:[#allocation3] sm:$0x1] %vm154_vm3, %v153_v7 }
 0x108   :  { %197 = shalt.err (!%p194_p4)
}
 0x109   :  { %165 = dma.vmem_to_hbm [thread:$0]  %s163_s17, 16, %s235_s2, [#allocation4]  }
 0x10a   :  { %206 = dma.done.wait [#allocation4], 16  }
 0x10b   :  { %207 = vsyncadd [#allocation4], 4294967280 }
 0x10c   :  { %169 = vsyncpa [#allocation4], 1 }

</bundles_post_ra>
